<compile_context>
chip_gen: v7x
topology: tpu7x:2x2x1
jax: 0.10.0
libtpu: 0.0.40
codegen_flags: <defaults>
</compile_context>

<pallas_src>
import jax
import jax.numpy as jnp
from jax import lax
from jax.experimental import pallas as pl
from jax.experimental.pallas import tpu as pltpu


def _round_up(v, m):
    return (v + m - 1) // m * m


def _vmem_capacity_bytes():
    """Physical VMEM per TensorCore (v5e/v6e: 128 MiB, v7x: 64 MiB); conservative fallback."""
    try:
        cap = getattr(pltpu.get_tpu_info(), "vmem_capacity_bytes", None)
        if cap:
            return int(cap)
    except Exception:
        pass
    return 64 << 20


def _make_kernel(C, C_pad, Vcols, Qcols, Ctot, compute_dtype):
    approx = compute_dtype != jnp.float32
    if compute_dtype == jnp.float32:
        cast = lambda a: a
    else:
        cast = lambda a: a.astype(compute_dtype)

    def kernel(gamma_ref, x_ref, w_ref, b_ref, o_ref):
        gamma = gamma_ref[0]                                   # scalar (SMEM), f32
        x = x_ref[...]                                         # (TB, N, C_pad) f32

        # Fused lane-aligned projection [ V | ones | Q | K ]: one MXU pass, f32 accumulation.
        qkv = lax.dot_general(cast(x), w_ref[...],
                              dimension_numbers=(((2,), (0,)), ((), ())),
                              preferred_element_type=jnp.float32)
        qkv = qkv + b_ref[...]                                 # f32 bias add (ones column -> 1.0)

        v_aug = qkv[:, :, :Vcols]                 # V | ones column | zero pad  (128-aligned)
        q = qkv[:, :, Vcols:Vcols + Qcols]        # Q | zero pad (zero cols don't change the dot)
        k = qkv[:, :, Vcols + Qcols:Ctot]         # K | zero pad

        # energy[b, i, j] = <q_bi, k_bj>  (TB-batched, contract channel axes, no explicit k.T)
        energy = lax.dot_general(cast(q), cast(k),
                                 dimension_numbers=(((2,), (2,)), ((0,), (0,))),
                                 preferred_element_type=jnp.float32)       # (TB, N, N) f32

        # Stabilized softmax numerator; exp in bf16 on the fast path (packed EUP/VPU).
        m = jnp.max(energy, axis=-1, keepdims=True)
        p = jnp.exp(cast(energy - m))

        # P @ [V | 1 | 0]: the ones column carries the softmax denominator in the MXU f32
        # accumulator — replaces the N^2 cross-lane rowsum on the XLU.
        out_aug = lax.dot_general(p, cast(v_aug),
                                  dimension_numbers=(((2,), (1,)), ((0,), (0,))),
                                  preferred_element_type=jnp.float32)      # (TB, N, Vcols) f32

        row_sum = out_aug[:, :, C:C + 1]                                   # (TB, N, 1) f32
        inv = pl.reciprocal(row_sum, approx=approx)

        # Normalize after the matmul (O(N*C_pad)), residual add, lane-dense store.
        o_ref[...] = gamma * (out_aug[:, :, :C_pad] * inv) + x

    return kernel


def _step_vmem_bytes(tb, N, C_pad, Vcols, Ctot, p_itemsize, w_bytes):
    io = 2 * 2 * tb * N * C_pad * 4                  # double-buffered x + out tiles
    proj = tb * N * Ctot * 4                         # fused qkv activations (f32)
    attn = tb * N * N * (4 + p_itemsize)             # energy (f32) + p
    outb = tb * N * Vcols * 4                        # P @ V_aug accumulator (f32)
    misc = tb * N * C_pad * 4 + (1 << 20)            # temporaries / slack
    return io + proj + attn + outb + misc + w_bytes


def selfpointbranch_pallas(x_nchw, params, *, compute_dtype=jnp.bfloat16):
    """x_nchw: (B, C, H, W) float32. params: dict of weights (see init_params)."""
    B, C, H, W = x_nchw.shape
    N = H * W
    C8 = C // 8

    # Lane-aligned sections of the fused projection output.
    C_pad = _round_up(C, 128)               # channel width of x / out inside the kernel
    Vcols = _round_up(C + 1, 128)           # V weights + ones column (softmax denominator)
    Qcols = _round_up(max(C8, 1), 128)
    Ctot = Vcols + 2 * Qcols

    # NCHW -> (B, N, C_pad) channels-last; zero-pad channels so stores are lane-dense.
    x_nc = jnp.transpose(x_nchw, (0, 2, 3, 1)).reshape(B, N, C).astype(jnp.float32)
    if C_pad != C:
        x_nc = jnp.pad(x_nc, ((0, 0), (0, 0), (0, C_pad - C)))

    gamma = params["gamma"].reshape(1).astype(jnp.float32)

    # Fused pre-transposed weight [ Wv | 0(ones) | pad | Wq | pad | Wk | pad ].  Zero rows for
    # padded input channels and zero columns in the padding, so padding never changes results.
    w_all = jnp.zeros((C_pad, Ctot), jnp.float32)
    w_all = w_all.at[:C, :C].set(params["wv"].astype(jnp.float32))
    w_all = w_all.at[:C, Vcols:Vcols + C8].set(params["wq"].astype(jnp.float32))
    w_all = w_all.at[:C, Vcols + Qcols:Vcols + Qcols + C8].set(params["wk"].astype(jnp.float32))
    w_all = w_all.astype(compute_dtype)

    b_all = jnp.zeros((Ctot,), jnp.float32)
    b_all = b_all.at[:C].set(params["bv"].astype(jnp.float32))
    b_all = b_all.at[C].set(1.0)            # constant-ones column (weights are zero there)
    b_all = b_all.at[Vcols:Vcols + C8].set(params["bq"].astype(jnp.float32))
    b_all = b_all.at[Vcols + Qcols:Vcols + Qcols + C8].set(params["bk"].astype(jnp.float32))
    b_all = b_all.reshape(1, 1, Ctot)

    # Generation-aware VMEM budgeting (v7x: ~36/40 MiB; v5e/v6e: ~100/104 MiB).
    capacity = _vmem_capacity_bytes()
    est_ceiling = max(capacity - (28 << 20), capacity // 2)
    p_itemsize = jnp.dtype(compute_dtype).itemsize
    w_bytes = C_pad * Ctot * jnp.dtype(compute_dtype).itemsize

    def est_fn(tb):
        return _step_vmem_bytes(tb, N, C_pad, Vcols, Ctot, p_itemsize, w_bytes)

    # Largest divisor of B that fits the budget, capped at B//2 so the grid keeps >= 2 steps
    # (both v7x TensorCores get work under dimension_semantics=("parallel",)).
    TB = None
    for tb in range(1, max(1, B // 2) + 1):
        if B % tb == 0 and est_fn(tb) <= est_ceiling:
            TB = tb
    if TB is None:
        # TODO(synk): flash-style online-softmax tiling over key/value blocks for very large H*W.
        raise ValueError(
            f"selfpointbranch_pallas: N={N} attention buffers (~{est_fn(1) >> 20} MiB) exceed "
            f"the VMEM budget ({est_ceiling >> 20} MiB); needs flash-style tiling.")

    est = est_fn(TB)
    vmem_limit = int(min(max(est + (4 << 20), 32 << 20), capacity - (24 << 20)))

    kernel = _make_kernel(C, C_pad, Vcols, Qcols, Ctot, compute_dtype)

    out_nc = pl.pallas_call(
        kernel,
        out_shape=jax.ShapeDtypeStruct((B, N, C_pad), jnp.float32),
        grid_spec=pltpu.PrefetchScalarGridSpec(
            num_scalar_prefetch=0,
            grid=(B // TB,),
            in_specs=[
                pl.BlockSpec(memory_space=pltpu.MemorySpace.SMEM),    # gamma (scalar)
                pl.BlockSpec((TB, N, C_pad), lambda b: (b, 0, 0)),    # x (residual)
                pl.BlockSpec((C_pad, Ctot), lambda b: (0, 0)),        # fused weight (resident)
                pl.BlockSpec((1, 1, Ctot), lambda b: (0, 0, 0)),      # fused bias (resident)
            ],
            out_specs=pl.BlockSpec((TB, N, C_pad), lambda b: (b, 0, 0)),
        ),
        compiler_params=pltpu.CompilerParams(
            dimension_semantics=("parallel",),
            vmem_limit_bytes=vmem_limit,
        ),
    )(gamma, x_nc, w_all, b_all)

    # (B, N, C_pad) -> NCHW, dropping padded channels.
    return jnp.transpose(out_nc[:, :, :C], (0, 2, 1)).reshape(B, C, H, W)


def selfpointbranch_ref(x_nchw, params):
    """Pure-JAX reference mirroring the PyTorch forward exactly (NCHW)."""
    B, C, H, W = x_nchw.shape
    N = H * W
    x_flat = x_nchw.reshape(B, C, N)                                   # (B, C, N)
    wq, bq = params["wq"], params["bq"]                                # (C, C8), (C8,)
    wk, bk = params["wk"], params["bk"]
    wv, bv = params["wv"], params["bv"]
    q = jnp.einsum('bcn,ce->ben', x_flat, wq) + bq[None, :, None]      # (B, C8, N)
    k = jnp.einsum('bcn,ce->ben', x_flat, wk) + bk[None, :, None]
    v = jnp.einsum('bcn,ce->ben', x_flat, wv) + bv[None, :, None]      # (B, C, N)
    energy = jnp.einsum('ben,bem->bnm', q, k)                          # (B, N, N)
    attn = jax.nn.softmax(energy, axis=-1)
    out = jnp.einsum('bcm,bnm->bcn', v, attn)                          # (B, C, N)
    out = out.reshape(B, C, H, W)
    return params["gamma"][0] * out + x_nchw


def init_params(key, C):
    C8 = C // 8
    ks = jax.random.split(key, 6)
    scale = 0.1
    return {
        "wq": scale * jax.random.normal(ks[0], (C, C8), jnp.float32),
        "bq": scale * jax.random.normal(ks[1], (C8,), jnp.float32),
        "wk": scale * jax.random.normal(ks[2], (C, C8), jnp.float32),
        "bk": scale * jax.random.normal(ks[3], (C8,), jnp.float32),
        "wv": scale * jax.random.normal(ks[4], (C, C), jnp.float32),
        "bv": scale * jax.random.normal(ks[5], (C,), jnp.float32),
        # PyTorch __init__ uses gamma = 0 (which makes out == x); use a nonzero value
        # so the attention path is actually exercised/verified.
        "gamma": jnp.array([0.5], jnp.float32),
    }


if __name__ == "__main__":
    B, C, H, W = 2, 32, 8, 8        # in_dim=32 -> C//8 = 4
    key = jax.random.PRNGKey(0)
    kx, kp = jax.random.split(key)
    x = jax.random.normal(kx, (B, C, H, W), jnp.float32)
    params = init_params(kp, C)

    y_ref = selfpointbranch_ref(x, params)

    # Exact path (f32 matmuls, exact reciprocal): tight tolerance vs the reference.
    y_f32 = jax.block_until_ready(selfpointbranch_pallas(x, params, compute_dtype=jnp.float32))
    assert y_f32.shape == (B, C, H, W)
    assert jnp.allclose(y_f32, y_ref, atol=1e-4, rtol=1e-4), float(jnp.max(jnp.abs(y_f32 - y_ref)))

    # Fast path (bf16 MXU inputs + bf16 exp, f32 accumulation, approx reciprocal).
    y_bf16 = jax.block_until_ready(selfpointbranch_pallas(x, params, compute_dtype=jnp.bfloat16))
    assert y_bf16.shape == (B, C, H, W)
    assert jnp.allclose(y_bf16, y_ref, atol=5e-2, rtol=5e-2), float(jnp.max(jnp.abs(y_bf16 - y_ref)))

    print("KERNEL_OK")
</pallas_src>

<mosaic_0001>
module attributes {stable_mosaic.version = 11 : i64} {
  func.func @kernel(%arg0: i32, %arg1: memref<1xf32, #tpu.memory_space<smem>>, %arg2: memref<1x64x128xf32, #tpu.memory_space<vmem>>, %arg3: memref<128x384xf32, #tpu.memory_space<vmem>>, %arg4: memref<1x1x384xf32, #tpu.memory_space<vmem>>, %arg5: memref<1x64x128xf32, #tpu.memory_space<vmem>>) attributes {dimension_semantics = [#tpu.dimension_semantics<parallel>], iteration_bounds = array<i64: 2>, scalar_prefetch = 0 : i64, scratch_operands = 0 : i64, tpu.core_type = #tpu.core_type<tc>, window_params = [{transform_indices = @transform_0, window_bounds = array<i64: 1>}, {transform_indices = @transform_1, window_bounds = array<i64: 1, 64, 128>}, {pipeline_mode = #tpu.pipeline_mode<synchronous>, transform_indices = @transform_2, window_bounds = array<i64: 128, 384>}, {pipeline_mode = #tpu.pipeline_mode<synchronous>, transform_indices = @transform_3, window_bounds = array<i64: 1, 1, 384>}, {transform_indices = @transform_4, window_bounds = array<i64: 1, 64, 128>}]} {
    %c0 = arith.constant 0 : index
    %0 = memref.load %arg1[%c0] : memref<1xf32, #tpu.memory_space<smem>>
    %c0_0 = arith.constant 0 : index
    %c0_1 = arith.constant 0 : index
    %c0_2 = arith.constant 0 : index
    %1 = vector.load %arg2[%c0_0, %c0_1, %c0_2] : memref<1x64x128xf32, #tpu.memory_space<vmem>>, vector<1x64x128xf32>
    %c0_3 = arith.constant 0 : index
    %c0_4 = arith.constant 0 : index
    %2 = vector.load %arg3[%c0_3, %c0_4] : memref<128x384xf32, #tpu.memory_space<vmem>>, vector<128x384xf32>
    %cst = arith.constant dense<0.000000e+00> : vector<1x64x384xf32>
    %3 = tpu.matmul %1, %2, %cst {dimension_numbers = #tpu.dot_dimension_numbers<[2], [0], [0, 1], [1], [0, 0, 0, 1, 1, 1], [], []>} : vector<1x64x128xf32>, vector<128x384xf32>, vector<1x64x384xf32> -> vector<1x64x384xf32>
    %c0_5 = arith.constant 0 : index
    %c0_6 = arith.constant 0 : index
    %c0_7 = arith.constant 0 : index
    %4 = vector.load %arg4[%c0_5, %c0_6, %c0_7] : memref<1x1x384xf32, #tpu.memory_space<vmem>>, vector<1x1x384xf32>
    %5 = vector.broadcast %4 : vector<1x1x384xf32> to vector<1x64x384xf32>
    %6 = arith.addf %3, %5 : vector<1x64x384xf32>
    %7 = vector.extract_strided_slice %6 {offsets = [0, 0, 0], sizes = [1, 64, 128], strides = [1, 1, 1]} : vector<1x64x384xf32> to vector<1x64x128xf32>
    %8 = vector.extract_strided_slice %6 {offsets = [0, 0, 128], sizes = [1, 64, 128], strides = [1, 1, 1]} : vector<1x64x384xf32> to vector<1x64x128xf32>
    %9 = vector.extract_strided_slice %6 {offsets = [0, 0, 256], sizes = [1, 64, 128], strides = [1, 1, 1]} : vector<1x64x384xf32> to vector<1x64x128xf32>
    %cst_8 = arith.constant dense<0.000000e+00> : vector<1x64x64xf32>
    %10 = tpu.matmul %8, %9, %cst_8 {dimension_numbers = #tpu.dot_dimension_numbers<[2], [2], [1], [1], [0, 0, 0, 1, 1, 1], [0], [0]>} : vector<1x64x128xf32>, vector<1x64x128xf32>, vector<1x64x64xf32> -> vector<1x64x64xf32>
    %cst_9 = arith.constant dense<0xFF800000> : vector<1x64xf32>
    %11 = vector.multi_reduction <maximumf>, %10, %cst_9 [2] : vector<1x64x64xf32> to vector<1x64xf32>
    %12 = vector.shape_cast %11 : vector<1x64xf32> to vector<1x64x1xf32>
    %13 = vector.broadcast %12 : vector<1x64x1xf32> to vector<1x64x64xf32>
    %14 = arith.subf %10, %13 : vector<1x64x64xf32>
    %15 = math.exp %14 : vector<1x64x64xf32>
    %cst_10 = arith.constant dense<0.000000e+00> : vector<1x64x128xf32>
    %16 = tpu.matmul %15, %7, %cst_10 {dimension_numbers = #tpu.dot_dimension_numbers<[2], [1], [1], [2], [0, 0, 0, 1, 1, 2], [0], [0]>} : vector<1x64x64xf32>, vector<1x64x128xf32>, vector<1x64x128xf32> -> vector<1x64x128xf32>
    %17 = vector.extract_strided_slice %16 {offsets = [0, 0, 32], sizes = [1, 64, 1], strides = [1, 1, 1]} : vector<1x64x128xf32> to vector<1x64x1xf32>
    %18 = tpu.reciprocal %17 : vector<1x64x1xf32> -> vector<1x64x1xf32>
    %19 = vector.broadcast %18 : vector<1x64x1xf32> to vector<1x64x128xf32>
    %20 = arith.mulf %16, %19 : vector<1x64x128xf32>
    %21 = vector.broadcast %0 : f32 to vector<1x64x128xf32>
    %22 = arith.mulf %21, %20 : vector<1x64x128xf32>
    %23 = arith.addf %22, %1 : vector<1x64x128xf32>
    %c0_11 = arith.constant 0 : index
    %c0_12 = arith.constant 0 : index
    %c0_13 = arith.constant 0 : index
    %24 = vector.load %arg5[%c0_11, %c0_12, %c0_13] : memref<1x64x128xf32, #tpu.memory_space<vmem>>, vector<1x64x128xf32>
    tpu.vector_store %arg5[%c0_11, %c0_12, %c0_13], %23 {strides = array<i32>} : memref<1x64x128xf32, #tpu.memory_space<vmem>>, vector<1x64x128xf32>,
    return
  }
  func.func @transform_0(%arg0: i32) -> i32 {
    %c0_i32 = arith.constant 0 : i32
    %c0_i32_0 = arith.constant 0 : i32
    return %c0_i32 : i32
  }
  func.func @transform_1(%arg0: i32) -> (i32, i32, i32) {
    %c0_i32 = arith.constant 0 : i32
    %c0_i32_0 = arith.constant 0 : i32
    %c0_i32_1 = arith.constant 0 : i32
    return %arg0, %c0_i32, %c0_i32_0 : i32, i32, i32
  }
  func.func @transform_2(%arg0: i32) -> (i32, i32) {
    %c0_i32 = arith.constant 0 : i32
    %c0_i32_0 = arith.constant 0 : i32
    %c0_i32_1 = arith.constant 0 : i32
    return %c0_i32, %c0_i32_0 : i32, i32
  }
  func.func @transform_3(%arg0: i32) -> (i32, i32, i32) {
    %c0_i32 = arith.constant 0 : i32
    %c0_i32_0 = arith.constant 0 : i32
    %c0_i32_1 = arith.constant 0 : i32
    %c0_i32_2 = arith.constant 0 : i32
    return %c0_i32, %c0_i32_0, %c0_i32_1 : i32, i32, i32
  }
  func.func @transform_4(%arg0: i32) -> (i32, i32, i32) {
    %c0_i32 = arith.constant 0 : i32
    %c0_i32_0 = arith.constant 0 : i32
    %c0_i32_1 = arith.constant 0 : i32
    return %arg0, %c0_i32, %c0_i32_0 : i32, i32, i32
  }
}

</mosaic_0001>

<bundles_post_ra>
// kernel: tpu_custom_call.1
= control target key start
LH: loop header
LB: loop body
LE: loop exit
PB: predicated region body
PF: predicated region fallthrough
CT: control target
= control target key end

     0   :  { %s1834_s0 = inlined_call_operand.<no memory space> [shape: f32[1], index: 0, kind: input, shape index: {}]   ;;  %s1835_s1 = inlined_call_operand.hbm [shape: f32[2,64,128], index: 1, kind: input, shape index: {}]   ;;  %s1836_s2 = inlined_call_operand.hbm [shape: f32[128,384], index: 2, kind: input, shape index: {}]   ;;  %s1837_s3 = inlined_call_operand.vmem [shape: f32[1,1,384], index: 3, kind: input, shape index: {}]   ;;  %s1838_s4 = inlined_call_operand.hbm [shape: f32[2,64,128], index: 4, kind: output, shape index: {}]  }
   0x1   :  { %9 = sst [smem:[#allocation2]] %s1834_s0 }
   0x2   :  { %10 = vsyncpa [#allocation4], 0 }
   0x3   :  { %12 = vsyncpa [#allocation4 + $0x1], 0 }
   0x4   :  { %13 = vsyncpa [#allocation7], 0 }
   0x5   :  { %14 = vsyncpa [#allocation5], 0 }
   0x6   :  { %16 = vsyncpa [#allocation5 + $0x1], 0  ;;  %s1531_s17 = smov 0   ;;  %s1533_s18 = smov 0  }
   0x7   :  { %s1535_s19 = smov 0   ;;  %s1537_s20 = smov 0  }
   0x8 LB: > { %s1552_s0 = sadd.s32 4294967295, %s1490_s20   ;;  %s985_s21 = sadd.s32 4294967294, %s1490_s20   ;;  %s1490_s20 = sphi %s1537_s20, %s1858_s20   ;;  %s1486_s19 = sphi %s1535_s19, %s1857_s19   ;;  %s1482_s18 = sphi %s1533_s18, %s1856_s18   ;;  %s1478_s17 = sphi %s1531_s17, %s1855_s17  }
   0x9   : > { %p63_p0 = scmp.ne.s32.totalorder %s1482_s18, %s1478_s17  ;;  %p1839_p1 = scmp.eq.s32.totalorder %s1552_s0, 0 }
   0xa   : > { %p135_p3 = scmp.eq.s32.totalorder %s985_s21, 1  ;;  %p986_p5 = scmp.ge.s32.totalorder %s1490_s20, 1 }
   0xb   : > { %p1561_p4 = por %p1839_p1, %p63_p0  ;;  %p142_p7 = scmp.lt.s32.totalorder %s1490_s20, 3 }
   0xc   : > { %p1566_p6 = por %p135_p3, %p63_p0  ;;  %s1492_s25 = smov [#allocation6]  }
   0xd   : > { %s1842_s22 = scalar_select %p1561_p4, 1, 0 }
   0xe   : > { %s1843_s23 = scalar_select %p1566_p6, 1, 0 }
   0xf   : > { %p1571_p8 = pnand %p986_p5, %p142_p7  ;;  %s157_s26 = sshll.u32 %s1492_s25, 4  ;;  %s1575_s26 = int_to_ptr.vmem [resolvable:$true] %s157_s26 }
  0x10   : > { %s1587_s28 = sadd.s32 1, %s1490_s20   ;;  %s50_s29 = sadd.s32 1, %s1486_s19 }
  0x11   : > { %s1844_s24 = scalar_select %p1571_p8, 1, 0 }
  0x12   : > { %p1271_p9 = pneg %p1571_p8  ;;  %s47_s30 = ssub.s32 %s1490_s20, %s1587_s28 }
  0x13   : > { %s1362_s7 = scalar_lea.hbm %s1836_s2, 6144 }
  0x14   : > { %p1582_p11 = pnand %p1271_p9, %p1839_p1  ;;  %p1363_p12 = scmp.ne.s32.totalorder %s1836_s2, %s1362_s7 }
  0x15   : > { %p1369_p5 = scmp.lt.u32.totalorder %s1362_s7, %s1836_s2 }
  0x16   : > { %p1364_p13 = pneg %p1582_p11 }
  0x18   : > { %p1365_p0 = pnand %p1364_p13, %p1363_p12 }
  0x1a   : > { %p1366_p3 = pneg %p1365_p0 }
  0x1c   : > { %p1371_p7 = pnand %p1369_p5, %p1366_p3 }
  0x1e   : > { %1374 = shalt.err (!%p1371_p7)
}
  0x1f   : > { %s1375_s12 = scalar_lea.vmem %s1575_s26, 6144  ;;  %p1383_p2 = scmp.lt.s32.totalorder %s1575_s26, %s1575_s26 }
  0x20   : > { %p1376_p9 = scmp.ne.s32.totalorder %s1575_s26, %s1375_s12  ;;  %p1384_p6 = scmp.lt.s32.totalorder %s1375_s12, %s1375_s12 }
  0x22   : > { %p1378_p10 = pnand %p1376_p9, %p1364_p13  ;;  %p1385_p4 = por %p1384_p6, %p1383_p2 }
  0x24   : > { %p1379_p1 = pneg %p1378_p10 }
  0x26   : > { %p1386_p8 = pnand %p1385_p4, %p1379_p1 }
  0x28   : > { %1389 = shalt.err (!%p1386_p8)
}
  0x29   : > { %s1493_s13 = smov 384   ;;  %s1494_s14 = smov 24  }
  0x2a   : > { %1274 = dma.hbm_to_vmem [thread:$0]  (!%p1582_p11), %s1836_s2, 6144, %s1575_s26, [#allocation7], %s1493_s13, %s1493_s13, %s1494_s14  }
  0x2b   : > { %p48_p2 = scmp.eq.s32.totalorder %s47_s30, 0  ;;  %p57_p1 = scmp.ne.s32.totalorder %s1486_s19, %s1482_s18 }
  0x2c   : > { %p58_p4 = scmp.eq.s32.totalorder %s1490_s20, 0  ;;  %p1284_p6 = scmp.lt.s32.totalorder %s1490_s20, 2 }
  0x2d   : > { %s1618_s21 = scalar_select %p48_p2, %s1486_s19, %s50_s29  }
  0x2e   : > { %p59_p8 = por %p58_p4, %p57_p1  ;;  %p1846_p10 = scmp.eq.s32.totalorder %s1552_s0, 1 }
  0x2f   : > { %s174_s5 = sand.u32 1, %s1486_s19   ;;  %s1009_s6 = sshll.u32 %s1490_s20, 10 }
  0x30   : > { %p1622_p12 = por %p1846_p10, %p57_p1  ;;  %s989_s7 = sshll.u32 %s174_s5, 6 }
  0x31   : > { %s1631_s9 = scalar_lea.hbm %s1835_s1, %s1009_s6  ;;  %s178_s26 = scalar_lea.vmem [#allocation3], %s989_s7 }
  0x32   : > { %s185_s29 = sshll.u32 %s178_s26, 4  ;;  %p1633_p11 = pnand %p1284_p6, %p59_p8  ;;  %s1637_s29 = int_to_ptr.vmem [resolvable:$true] %s185_s29 }
  0x33   : > { %s1639_s10 = scalar_lea.sflag [#allocation4], %s174_s5  ;;  %s1390_s11 = scalar_lea.hbm %s1631_s9, 1024 }
  0x34   : > { %p1391_p13 = scmp.ne.s32.totalorder %s1631_s9, %s1390_s11  ;;  %p1392_p0 = pneg %p1633_p11 }
  0x35   : > { %s1395_s14 = scalar_lea.hbm %s1835_s1, 2048  ;;  %p1396_p7 = scmp.lt.u32.totalorder %s1631_s9, %s1835_s1 }
  0x36   : > { %p1393_p3 = pnand %p1392_p0, %p1391_p13  ;;  %p1397_p9 = scmp.lt.u32.totalorder %s1395_s14, %s1390_s11 }
  0x37   : > { %p1399_p1 = scmp.lt.u32.totalorder %s1390_s11, %s1631_s9 }
  0x38   : > { %p1394_p5 = pneg %p1393_p3  ;;  %p1398_p2 = por %p1397_p9, %p1396_p7 }
  0x3a   : > { %p1400_p4 = por %p1399_p1, %p1398_p2 }
  0x3c   : > { %p1401_p6 = pnand %p1400_p4, %p1394_p5 }
  0x3e   : > { %1404 = shalt.err (!%p1401_p6)
}
  0x3f   : > { %s1405_s5 = scalar_lea.vmem %s1637_s29, 1024  ;;  %s1495_s6 = smov [#allocation3]  }
  0x40   : > { %p1406_p8 = scmp.ne.s32.totalorder %s1637_s29, %s1405_s5  ;;  %s1410_s7 = sshll.u32 %s1495_s6, 4  ;;  %s1411_s7 = int_to_ptr.vmem [resolvable:$false] %s1410_s7 }
  0x41   : > { %s1412_s27 = scalar_lea.vmem %s1411_s7, 2048  ;;  %p1413_p3 = scmp.lt.s32.totalorder %s1637_s29, %s1411_s7 }
  0x42   : > { %p1408_p10 = pnand %p1406_p8, %p1392_p0  ;;  %p1414_p7 = scmp.lt.s32.totalorder %s1412_s27, %s1405_s5 }
  0x44   : > { %p1409_p13 = pneg %p1408_p10  ;;  %p1415_p9 = por %p1414_p7, %p1413_p3 }
  0x46   : > { %p1416_p2 = pnand %p1415_p9, %p1409_p13 }
  0x48   : > { %1419 = shalt.err (!%p1416_p2)
}
  0x49   : > { %s1496_s8 = smov 128   ;;  %s1497_s26 = smov 8  }
  0x4a   : > { %1278 = dma.hbm_to_vmem [thread:$0]  (!%p1633_p11), %s1631_s9, 1024, %s1637_s29, %s1639_s10, %s1496_s8, %s1496_s8, %s1497_s26  }
  0x4b   : > { %p1849_p0 = scmp.ne.s32.totalorder %s1844_s24, 0 }
  0x4c   : > { %s1670_s11 = sand.u32 (!%p1849_p0), 1, %s1482_s18   ;;  %p1850_p5 = scmp.ne.s32.totalorder (!%p1849_p0), %s1842_s22, 0 }
  0x4d   : > { %197 = sbr.rel (%p1849_p0) target bundleno = 1143 (0x477), region = 36  ;;  %s993_s12 = sshll.u32 (!%p1849_p0), %s1670_s11, 6 }
  0x4e   : > { %s200_s13 = scalar_lea.sflag (!%p1849_p0), [#allocation4], %s1670_s11  ;;  %s1676_s14 = scalar_lea.vmem (!%p1849_p0), [#allocation3], %s993_s12 }
  0x54   : > { %1465 = dma.done.wait (%p1850_p5), %s200_s13, 1024  }
  0x55   : > { %1467 = vsyncadd (%p1850_p5), %s200_s13, 4294966272  ;;  %p1851_p11 = scmp.eq.s32.totalorder %s1552_s0, 0 }
  0x57   : > { %1469 = dma.done.wait (%p1851_p11), [#allocation7], 6144   ;;  %p1852_p1 = pmov %p1851_p11 }
  0x58   : > { %v1498_v0 = vmov 0.0   ;;  %v243_v1 = vld [vmem:[#allocation6 + $0x10] sm:$0xff]  ;;  %v246_v2 = vld [vmem:[#allocation6 + $0x28] sm:$0xff]  ;;  %v249_v3 = vld [vmem:[#allocation6 + $0x40] sm:$0xff]  ;;  %vm629_vm0 = vcmask 523264   ;;  %s232_s9 = sld [smem:[#allocation2]] }
  0x59   : > { %1471 = vsyncadd (%p1852_p1), [#allocation7], 4294961152  ;;  %370 = vmatprep.mubr.f32.mxu0 %v1498_v0  ;;  %v1199_v4 = vpack.c.bf16 %v246_v2, %v243_v1  ;;  %v252_v5 = vld [vmem:[#allocation6 + $0x58] sm:$0xff]  ;;  %v255_v7 = vld [vmem:[#allocation6 + $0x70] sm:$0xff]  ;;  %s1767_s29 = scalar_lea.vmem [#allocation8], %s993_s12  ;;  %s1010_s30 = sshll.u32 %s1552_s0, 10 }
  0x5a   : > { %v1203_v6 = vpack.c.bf16 %v252_v5, %v249_v3  ;;  %v258_v8 = vld [vmem:[#allocation6 + $0x88] sm:$0xff]  ;;  %v245_v10 = vld [vmem:[#allocation6 + $0x20] sm:$0xff]  ;;  %v244_v13 = vld [vmem:[#allocation6 + $0x18] sm:$0xff]  ;;  %s902_s10 = sshll.u32 %s1767_s29, 4  ;;  %s1786_s5 = scalar_lea.hbm %s1838_s4, %s1010_s30  ;;  %s1788_s10 = int_to_ptr.vmem [resolvable:$true] %s902_s10 }
  0x5b   : > { %1200 = vmatprep.subr.bf16.mxu1 %v1199_v4  ;;  %v242_v9 = vld [vmem:[#allocation6 + $0x8] sm:$0xff]  ;;  %v241_v12 = vld [vmem:[#allocation6] sm:$0xff]  ;;  %v1207_v14 = vpack.c.bf16 %v258_v8, %v255_v7  ;;  %v248_v17 = vld [vmem:[#allocation6 + $0x38] sm:$0xff]  ;;  %s889_s6 = scalar_lea.sflag [#allocation5], %s1670_s11  ;;  %s1420_s7 = scalar_lea.vmem %s1788_s10, 1024 }
  0x5c   : > { %1202 = vmatpush3.bf16.msra.mxu1 %v1199_v4  ;;  %v1167_v11 = vpack.c.bf16 %v245_v10, %v242_v9  ;;  %v261_v15 = vld [vmem:[#allocation6 + $0xa0] sm:$0xff]  ;;  %v1169_v16 = vpack.c.bf16 %v244_v13, %v241_v12  ;;  %v251_v18 = vld [vmem:[#allocation6 + $0x50] sm:$0xff]  ;;  %v264_v19 = vld [vmem:[#allocation6 + $0xb8] sm:$0xff]  ;;  %p1421_p4 = scmp.ne.s32.totalorder %s1788_s10, %s1420_s7  ;;  %s1500_s0 = smov [#allocation8]  }
  0x5d   : > { %1204 = vmatprep.subr.bf16.mxu1 %v1203_v6  ;;  %v1171_v20 = vpack.c.bf16 %v251_v18, %v248_v17  ;;  %v247_v21 = vld [vmem:[#allocation6 + $0x30] sm:$0xff]  ;;  %v250_v22 = vld [vmem:[#allocation6 + $0x48] sm:$0xff]  ;;  %v257_v25 = vld [vmem:[#allocation6 + $0x80] sm:$0xff]  ;;  %v1211_v29 = vpack.c.bf16 %v264_v19, %v261_v15  ;;  %v291_v18 = vlaneseq  ;;  %s1424_s27 = sshll.u32 %s1500_s0, 4  ;;  %s1425_s27 = int_to_ptr.vmem [resolvable:$false] %s1424_s27 }
  0x5e   : > { %1168 = vmatprep.subr.bf16.mxu0 %v1167_v11  ;;  %v1173_v23 = vpack.c.bf16 %v250_v22, %v247_v21  ;;  %v254_v24 = vld [vmem:[#allocation6 + $0x68] sm:$0xff]  ;;  %v253_v27 = vld [vmem:[#allocation6 + $0x60] sm:$0xff]  ;;  %v256_v28 = vld [vmem:[#allocation6 + $0x78] sm:$0xff]  ;;  %p1422_p6 = pnand %p1421_p4, %p1622_p12  ;;  %s1426_s8 = scalar_lea.vmem %s1425_s27, 2048 }
  0x5f   : > { %1170 = vmatpush1.bf16.msra.mxu0 %v1169_v16  ;;  %v1175_v26 = vpack.c.bf16 %v257_v25, %v254_v24  ;;  %v260_v30 = vld [vmem:[#allocation6 + $0x98] sm:$0xff]  ;;  %v263_v31 = vld [vmem:[#allocation6 + $0xb0] sm:$0xff]  ;;  %v270_v33 = vld [vmem:[#allocation6 + $0xe8] sm:$0xff]  ;;  %v1177_v35 = vpack.c.bf16 %v256_v28, %v253_v27  ;;  %v292_v19 = vshrl.u32 %v291_v18, 7  ;;  %p1427_p10 = scmp.lt.s32.totalorder %s1788_s10, %s1425_s27  ;;  %p1428_p13 = scmp.lt.s32.totalorder %s1426_s8, %s1420_s7 }
  0x60   : > { %1206 = vmatpush3.bf16.msra.mxu1 %v1203_v6  ;;  %1172 = vmatprep.subr.bf16.mxu0 %v1171_v20  ;;  %v267_v32 = vld [vmem:[#allocation6 + $0xd0] sm:$0xff]  ;;  %v1688_v34 = vld [vmem:[%s1676_s14] sm:$0xff]  ;;  %v1179_v36 = vpack.c.bf16 %v263_v31, %v260_v30  ;;  %v262_v38 = vld [vmem:[#allocation6 + $0xa8] sm:$0xff]  ;;  %p1423_p8 = pneg %p1422_p6 }
  0x61   : > { %1208 = vmatprep.subr.bf16.mxu1 %v1207_v14  ;;  %1099 = vmatprep.mubr.f32.mxu1 %v1688_v34  ;;  %v259_v37 = vld [vmem:[#allocation6 + $0x90] sm:$0xff]  ;;  %v1215_v39 = vpack.c.bf16 %v270_v33, %v267_v32  ;;  %v266_v40 = vld [vmem:[#allocation6 + $0xc8] sm:$0xff]  ;;  %v269_v41 = vld [vmem:[#allocation6 + $0xe0] sm:$0xff]  ;;  %v301_v20 = vsub.s32 2, %v292_v19  ;;  %v293_v24 = vsub.s32 0, %v292_v19  ;;  %p1429_p3 = por %p1428_p13, %p1427_p10 }
  0x62   : > { %v273_v42 = vld [vmem:[#allocation6 + $0x100] sm:$0xff]  ;;  %v276_v43 = vld [vmem:[#allocation6 + $0x118] sm:$0xff]  ;;  %v1181_v44 = vpack.c.bf16 %v262_v38, %v259_v37  ;;  %v1183_v45 = vpack.c.bf16 %v269_v41, %v266_v40  ;;  %v275_v50 = vld [vmem:[#allocation6 + $0x110] sm:$0xff] }
  0x63   : > { %1174 = vmatpush1.bf16.msra.mxu0 %v1173_v23  ;;  %v265_v46 = vld [vmem:[#allocation6 + $0xc0] sm:$0xff]  ;;  %v268_v47 = vld [vmem:[#allocation6 + $0xd8] sm:$0xff]  ;;  %v1219_v48 = vpack.c.bf16 %v276_v43, %v273_v42  ;;  %v279_v51 = vld [vmem:[#allocation6 + $0x130] sm:$0xff]  ;;  %v297_v23 = vsub.s32 1, %v292_v19  ;;  %p1430_p7 = pnand %p1429_p3, %p1423_p8 }
  0x64   : > { %1210 = vmatpush3.bf16.msra.mxu1 %v1207_v14  ;;  %1176 = vmatprep.subr.bf16.mxu0 %v1175_v26  ;;  %v272_v49 = vld [vmem:[#allocation6 + $0xf8] sm:$0xff]  ;;  %v282_v52 = vld [vmem:[#allocation6 + $0x148] sm:$0xff]  ;;  %v1185_v53 = vpack.c.bf16 %v268_v47, %v265_v46  ;;  %v271_v55 = vld [vmem:[#allocation6 + $0xf0] sm:$0xff] }
  0x65   : > { %1212 = vmatprep.subr.bf16.mxu1 %v1211_v29  ;;  %v1187_v54 = vpack.c.bf16 %v275_v50, %v272_v49  ;;  %v274_v56 = vld [vmem:[#allocation6 + $0x108] sm:$0xff]  ;;  %v1223_v57 = vpack.c.bf16 %v282_v52, %v279_v51  ;;  %v281_v59 = vld [vmem:[#allocation6 + $0x140] sm:$0xff]  ;;  %v288_v61 = vld [vmem:[#allocation6 + $0x178] sm:$0xff] }
  0x66   : > { %v278_v58 = vld [vmem:[#allocation6 + $0x128] sm:$0xff]  ;;  %v285_v60 = vld [vmem:[#allocation6 + $0x160] sm:$0xff]  ;;  %v1189_v62 = vpack.c.bf16 %v274_v56, %v271_v55  ;;  %v280_v2 = vld [vmem:[#allocation6 + $0x138] sm:$0xff] }
  0x67   : > { %1178 = vmatpush1.bf16.msra.mxu0 %v1177_v35  ;;  %v1191_v63 = vpack.c.bf16 %v281_v59, %v278_v58  ;;  %v277_v1 = vld [vmem:[#allocation6 + $0x120] sm:$0xff]  ;;  %v1227_v3 = vpack.c.bf16 %v288_v61, %v285_v60  ;;  %v284_v4 = vld [vmem:[#allocation6 + $0x158] sm:$0xff]  ;;  %v287_v5 = vld [vmem:[#allocation6 + $0x170] sm:$0xff] }
  0x68   : > { %1214 = vmatpush3.bf16.msra.mxu1 %v1211_v29  ;;  %1180 = vmatprep.subr.bf16.mxu0 %v1179_v36  ;;  %v1193_v6 = vpack.c.bf16 %v280_v2, %v277_v1  ;;  %v1195_v7 = vpack.c.bf16 %v287_v5, %v284_v4  ;;  %v283_v8 = vld [vmem:[#allocation6 + $0x150] sm:$0xff]  ;;  %v286_v9 = vld [vmem:[#allocation6 + $0x168] sm:$0xff]  ;;  %v1700_v13 = vld [vmem:[%s1676_s14 + $0x18] sm:$0xff] }
  0x69   : > { %1216 = vmatprep.subr.bf16.mxu1 %v1215_v39  ;;  %v1197_v10 = vpack.c.bf16 %v286_v9, %v283_v8  ;;  %v1692_v11 = vld [vmem:[%s1676_s14 + $0x8] sm:$0xff]  ;;  %v1695_v12 = vld [vmem:[%s1676_s14 + $0x10] sm:$0xff]  ;;  %v1703_v14 = vld [vmem:[%s1676_s14 + $0x20] sm:$0xff] }
  0x6a   : > { %v1710_v15 = vld [vmem:[%s1676_s14 + $0x28] sm:$0xff]  ;;  %v1713_v16 = vld [vmem:[%s1676_s14 + $0x30] sm:$0xff]  ;;  %v1720_v17 = vld [vmem:[%s1676_s14 + $0x38] sm:$0xff] }
  0x6b   : > { %1182 = vmatpush1.bf16.msra.mxu0 %v1181_v44  ;;  %v289_v21 = vld [vmem:[%s1837_s3] sm:$0x7] }
  0x6c   : > { %1218 = vmatpush3.bf16.msra.mxu1 %v1215_v39  ;;  %1184 = vmatprep.subr.bf16.mxu0 %v1183_v45  ;;  %v302_v22 = vrot.slane %v289_v21, %v301_v20  ;;  %v1737_v28 = vrot.slane %v289_v21, %v297_v23  ;;  %v294_v30 = vrot.slane %v289_v21, %v293_v24 }
  0x6d   : > { %1220 = vmatprep.subr.bf16.mxu1 %v1219_v48 }
  0x6f   : > { %1186 = vmatpush1.bf16.msra.mxu0 %v1185_v53 }
  0x70   : > { %1222 = vmatpush3.bf16.msra.mxu1 %v1219_v48  ;;  %1188 = vmatprep.subr.bf16.mxu0 %v1187_v54 }
  0x71   : > { %1224 = vmatprep.subr.bf16.mxu1 %v1223_v57 }
  0x73   : > { %1190 = vmatpush1.bf16.msra.mxu0 %v1189_v62 }
  0x74   : > { %1226 = vmatpush3.bf16.msra.mxu1 %v1223_v57  ;;  %1192 = vmatprep.subr.bf16.mxu0 %v1191_v63 }
  0x75   : > { %1228 = vmatprep.subr.bf16.mxu1 %v1227_v3 }
  0x77   : > { %1194 = vmatpush1.bf16.msra.mxu0 %v1193_v6 }
  0x78   : > { %1230 = vmatpush3.bf16.msra.mxu1 %v1227_v3  ;;  %1196 = vmatprep.subr.bf16.mxu0 %v1195_v7 }
  0x7b   : > { %1100 = vmatmul.mubr.f32.vlgmr.msra.gmra.mrb[0].mxu1 %v1692_v11  ;;  %1198 = vmatpush1.bf16.msra.mxu0 %v1197_v10 }
  0x7c   : > { %1102 = vmatprep.mubr.f32.mxu1 %v1695_v12 }
  0x7e   : > { %371 = vmatmul.mubr.f32.vlgmr.msra.gmra.mrb[0].mxu0 %v1688_v34 }
  0x7f   : > { %1103 = vmatmul.mubr.f32.gmra.mrb[2].mxu1 %v1700_v13  ;;  %376 = vmatprep.mubr.f32.mxu0 %v1498_v0 }
  0x80   : > { %1105 = vmatprep.mubr.f32.mxu1 %v1703_v14 }
  0x82   : > { %377 = vmatmul.mubr.f32.gmra.mrb[2].mxu0 %v1692_v11 }
  0x83   : > { %1106 = vmatmul.mubr.f32.gmra.mrb[4].mxu1 %v1710_v15  ;;  %382 = vmatprep.mubr.f32.mxu0 %v1498_v0 }
  0x84   : > { %1108 = vmatprep.mubr.f32.mxu1 %v1713_v16 }
  0x86   : > { %383 = vmatmul.mubr.f32.gmra.mrb[4].mxu0 %v1695_v12 }
  0x87   : > { %1109 = vmatmul.mubr.f32.gmra.mrb[6].mxu1 %v1720_v17  ;;  %388 = vmatprep.mubr.f32.mxu0 %v1498_v0 }
  0x8a   : > { %389 = vmatmul.mubr.f32.gmra.mrb[6].mxu0 %v1700_v13 }
  0x8b   : > { %394 = vmatprep.mubr.f32.mxu0 %v1498_v0 }
  0x8e   : > { %395 = vmatmul.mubr.f32.gmra.mrb[8].mxu0 %v1703_v14 }
  0x8f   : > { %400 = vmatprep.mubr.f32.mxu0 %v1498_v0 }
  0x92   : > { %401 = vmatmul.mubr.f32.gmra.mrb[10].mxu0 %v1710_v15 }
  0x93   : > { %406 = vmatprep.mubr.f32.mxu0 %v1498_v0 }
  0x96   : > { %407 = vmatmul.mubr.f32.gmra.mrb[12].mxu0 %v1713_v16 }
  0x97   : > { %412 = vmatprep.mubr.f32.mxu0 %v1498_v0 }
  0x9a   : > { %413 = vmatmul.mubr.f32.gmra.mrb[14].mxu0 %v1720_v17 }
 0x14e   : > { %v1101_v25 = vpop.f32.mrb[0].mxu1 }
 0x14f   : > { %v491_v26 = vadd.f32 %v1101_v25, %v302_v22  ;;  %v485_v27 = vpop.f32.mrb[1].mxu1 }
 0x150   : > { %v486_v29 = vadd.f32 %v485_v27, %v302_v22 }
 0x151   : > { %v372_v0 = vpop.f32.mrb[0].mxu0 }
 0x152   : > { %v1231_v31 = vpack.c.bf16 %v491_v26, %v486_v29  ;;  %v1104_v32 = vpop.f32.mrb[2].mxu1  ;;  %v374_v33 = vpop.f32.mrb[1].mxu0  ;;  %v373_v39 = vadd.f32 %v372_v0, %v294_v30 }
 0x153   : > { %v501_v35 = vadd.f32 %v1104_v32, %v302_v22  ;;  %v495_v36 = vpop.f32.mrb[3].mxu1  ;;  %v375_v37 = vadd.f32 %v374_v33, %v1737_v28 }
 0x154   : > { %1232 = vmatprep.subr.bf16.mxu0 %v1231_v31  ;;  %v496_v38 = vadd.f32 %v495_v36, %v302_v22 }
 0x155   : > { %1234 = vmatpush3.bf16.xpose.msra.mxu0 %v1231_v31  ;;  %v378_v40 = vpop.f32.mrb[2].mxu0  ;;  %1127 = vmatprep.mubr.f32.mxu0 %v375_v37 }
 0x156   : > { %v1235_v41 = vpack.c.bf16 %v501_v35, %v496_v38  ;;  %v1107_v42 = vpop.f32.mrb[4].mxu1  ;;  %v379_v43 = vadd.f32 %v378_v40, %v294_v30  ;;  %v380_v44 = vpop.f32.mrb[3].mxu0 }
 0x157   : > { %v511_v45 = vadd.f32 %v1107_v42, %v302_v22  ;;  %v505_v46 = vpop.f32.mrb[5].mxu1  ;;  %v381_v20 = vadd.f32 %v380_v44, %v1737_v28 }
 0x158   : > { %1236 = vmatprep.subr.bf16.mxu0 %v1235_v41  ;;  %v506_v47 = vadd.f32 %v505_v46, %v302_v22  ;;  %v1247_v48 = vpack.c.bf16 %v379_v43, %v373_v39 }
 0x159   : > { %v384_v49 = vpop.f32.mrb[4].mxu0 }
 0x15a   : > { %v1239_v50 = vpack.c.bf16 %v511_v45, %v506_v47  ;;  %v1110_v51 = vpop.f32.mrb[6].mxu1  ;;  %1248 = vmatprep.subr.bf16.mxu1 %v1247_v48  ;;  %v386_v52 = vpop.f32.mrb[5].mxu0  ;;  %v385_v56 = vadd.f32 %v384_v49, %v294_v30 }
 0x15b   : > { %v521_v53 = vadd.f32 %v1110_v51, %v302_v22  ;;  %v515_v54 = vpop.f32.mrb[7].mxu1  ;;  %1250 = vmatpush3.bf16.msra.mxu1 %v1247_v48  ;;  %v387_v21 = vadd.f32 %v386_v52, %v1737_v28 }
 0x15c   : > { %v516_v55 = vadd.f32 %v515_v54, %v302_v22 }
 0x15d   : > { %1238 = vmatpush3.bf16.xpose.msra.mxu0 %v1235_v41  ;;  %v390_v57 = vpop.f32.mrb[6].mxu0 }
 0x15e   : > { %1240 = vmatprep.subr.bf16.mxu0 %v1239_v50  ;;  %v1243_v58 = vpack.c.bf16 %v521_v53, %v516_v55  ;;  %v391_v59 = vadd.f32 %v390_v57, %v294_v30  ;;  %v392_v60 = vpop.f32.mrb[7].mxu0 }
 0x15f   : > { %v393_v22 = vadd.f32 %v392_v60, %v1737_v28 }
 0x160   : > { %v1251_v61 = vpack.c.bf16 %v391_v59, %v385_v56 }
 0x161   : > { %v396_v62 = vpop.f32.mrb[8].mxu0 }
 0x162   : > { %1252 = vmatprep.subr.bf16.mxu1 %v1251_v61  ;;  %v398_v63 = vpop.f32.mrb[9].mxu0  ;;  %v397_v1 = vadd.f32 %v396_v62, %v294_v30 }
 0x163   : > { %1254 = vmatpush3.bf16.msra.mxu1 %v1251_v61  ;;  %v399_v23 = vadd.f32 %v398_v63, %v1737_v28 }
 0x165   : > { %1242 = vmatpush3.bf16.xpose.msra.mxu0 %v1239_v50  ;;  %v402_v2 = vpop.f32.mrb[10].mxu0 }
 0x166   : > { %1244 = vmatprep.subr.bf16.mxu0 %v1243_v58  ;;  %v403_v3 = vadd.f32 %v402_v2, %v294_v30  ;;  %v404_v4 = vpop.f32.mrb[11].mxu0 }
 0x167   : > { %v405_v24 = vadd.f32 %v404_v4, %v1737_v28 }
 0x168   : > { %v1255_v5 = vpack.c.bf16 %v403_v3, %v397_v1 }
 0x169   : > { %v408_v6 = vpop.f32.mrb[12].mxu0 }
 0x16a   : > { %v410_v7 = vpop.f32.mrb[13].mxu0  ;;  %1256 = vmatprep.subr.bf16.mxu1 %v1255_v5  ;;  %v409_v8 = vadd.f32 %v408_v6, %v294_v30 }
 0x16b   : > { %1258 = vmatpush3.bf16.msra.mxu1 %v1255_v5  ;;  %v411_v25 = vadd.f32 %v410_v7, %v1737_v28 }
 0x16d   : > { %1246 = vmatpush3.bf16.xpose.msra.mxu0 %v1243_v58  ;;  %v414_v9 = vpop.f32.mrb[14].mxu0 }
 0x16e   : > { %v415_v10 = vadd.f32 %v414_v9, %v294_v30  ;;  %v416_v18 = vpop.f32.mrb[15].mxu0 }
 0x16f   : > { %v417_v26 = vadd.f32 %v416_v18, %v1737_v28 }
 0x170   : > { %v1259_v19 = vpack.c.bf16 %v415_v10, %v409_v8 }
 0x172   : > { %1260 = vmatprep.subr.bf16.mxu1 %v1259_v19 }
 0x173   : > { %1262 = vmatpush3.bf16.msra.mxu1 %v1259_v19  ;;  %v1499_v19 = vmov 32  }
 0x174   : > { %1128 = vmatmul.mubr.f32.vlgmr.msra.gmra.mrb[16].mxu0 %v381_v20  ;;  %1329 = vset.pattern.permute.xlu1 %v1499_v19 }
 0x175   : > { %1130 = vmatprep.mubr.f32.mxu0 %v387_v21  ;;  %1328 = vset.pattern.permute.xlu0 %v1499_v19 }
 0x178   : > { %1131 = vmatmul.mubr.f32.gmra.mrb[18].mxu0 %v393_v22 }
 0x179   : > { %1133 = vmatprep.mubr.f32.mxu0 %v399_v23 }
 0x17c   : > { %1134 = vmatmul.mubr.f32.gmra.mrb[20].mxu0 %v405_v24 }
 0x17d   : > { %1136 = vmatprep.mubr.f32.mxu0 %v411_v25 }
 0x180   : > { %1137 = vmatmul.mubr.f32.gmra.mrb[22].mxu0 %v417_v26 }
 0x247   : > { %v1129_v27 = vpop.f32.mrb[16].mxu0 }
 0x248   : > { %v590_v29 = vpop.f32.mrb[17].mxu0  ;;  %v633_v32 = vsel %vm629_vm0, %v1129_v27, -inf }
 0x249   : > { %v630_v30 = vsel %vm629_vm0, %v590_v29, -inf }
 0x24a   : > { %631 = vmax.xlane.f32.xlu0 %v630_v30 }
 0x24b   : > { %v1132_v0 = vpop.f32.mrb[18].mxu0 }
 0x24c   : > { %v600_v31 = vpop.f32.mrb[19].mxu0  ;;  %v639_v28 = vsel %vm629_vm0, %v1132_v0, -inf }
 0x24d   : > { %v636_v33 = vsel %vm629_vm0, %v600_v31, -inf }
 0x24e   : > { %634 = vmax.xlane.f32.xlu0 %v633_v32  ;;  %637 = vmax.xlane.f32.xlu1 %v636_v33 }
 0x24f   : > { %v1135_v35 = vpop.f32.mrb[20].mxu0 }
 0x250   : > { %v610_v36 = vpop.f32.mrb[21].mxu0  ;;  %v645_v39 = vsel %vm629_vm0, %v1135_v35, -inf }
 0x251   : > { %v642_v37 = vsel %vm629_vm0, %v610_v36, -inf }
 0x252   : > { %640 = vmax.xlane.f32.xlu1 %v639_v28  ;;  %643 = vmax.xlane.f32.xlu0 %v642_v37  ;;  %v863_v37 = vstv %s232_s9 }
 0x253   : > { %v1138_v38 = vpop.f32.mrb[22].mxu0 }
 0x254   : > { %v620_v40 = vpop.f32.mrb[23].mxu0  ;;  %v651_v42 = vsel %vm629_vm0, %v1138_v38, -inf }
 0x255   : > { %v648_v41 = vsel %vm629_vm0, %v620_v40, -inf }
 0x256   : > { %646 = vmax.xlane.f32.xlu1 %v645_v39  ;;  %649 = vmax.xlane.f32.xlu0 %v648_v41 }
 0x25a   : > { %652 = vmax.xlane.f32.xlu1 %v651_v42 }
 0x2d7   : > { %v632_v43 = vpop.xlane.xlu0 %631 }
 0x2d8   : > { %v654_v44 = vsub.f32 %v590_v29, %v632_v43 }
 0x2da   : > { %v662_v45 = vmul.f32 1.442695, %v654_v44 }
 0x2db   : > { %v635_v46 = vpop.xlane.xlu0 %634  ;;  %v638_v47 = vpop.xlane.xlu1 %637 }
 0x2dc   : > { %1330 = vpow2.f32 %v662_v45  ;;  %v655_v48 = vsub.f32 %v1129_v27, %v635_v46  ;;  %v656_v49 = vsub.f32 %v600_v31, %v638_v47 }
 0x2de   : > { %v664_v50 = vmul.f32 1.442695, %v655_v48  ;;  %v666_v51 = vmul.f32 1.442695, %v656_v49 }
 0x2df   : > { %v641_v52 = vpop.xlane.xlu1 %640  ;;  %v644_v53 = vpop.xlane.xlu0 %643 }
 0x2e0   : > { %1332 = vpow2.f32 %v664_v50  ;;  %v657_v54 = vsub.f32 %v1132_v0, %v641_v52  ;;  %v658_v55 = vsub.f32 %v610_v36, %v644_v53 }
 0x2e1   : > { %1334 = vpow2.f32 %v666_v51 }
 0x2e2   : > { %v668_v56 = vmul.f32 1.442695, %v657_v54  ;;  %v670_v57 = vmul.f32 1.442695, %v658_v55 }
 0x2e3   : > { %v647_v58 = vpop.xlane.xlu1 %646  ;;  %v650_v59 = vpop.xlane.xlu0 %649 }
 0x2e4   : > { %1336 = vpow2.f32 %v668_v56  ;;  %v659_v60 = vsub.f32 %v1135_v35, %v647_v58  ;;  %v660_v61 = vsub.f32 %v620_v40, %v650_v59 }
 0x2e5   : > { %1338 = vpow2.f32 %v670_v57 }
 0x2e6   : > { %v1331_v62 = vpop.eup %1330  ;;  %v672_v63 = vmul.f32 1.442695, %v659_v60  ;;  %v674_v1 = vmul.f32 1.442695, %v660_v61 }
 0x2e7   : > { %1155 = vmatprep.mubr.msk.f32.mxu1 %vm629_vm0, %v1331_v62  ;;  %v653_v2 = vpop.xlane.xlu1 %652 }
 0x2e8   : > { %1340 = vpow2.f32 %v672_v63  ;;  %v661_v3 = vsub.f32 %v1138_v38, %v653_v2 }
 0x2e9   : > { %1342 = vpow2.f32 %v674_v1 }
 0x2ea   : > { %v1333_v4 = vpop.eup %1332  ;;  %v676_v5 = vmul.f32 1.442695, %v661_v3 }
 0x2eb   : > { %v1335_v6 = vpop.eup %1334  ;;  %1156 = vmatmul.mubr.msk.f32.vlgmr.msra.gmra.mrb[8].mxu1 %vm629_vm0, %v1333_v4 }
 0x2ec   : > { %1344 = vpow2.f32 %v676_v5  ;;  %1158 = vmatprep.mubr.msk.f32.mxu1 %vm629_vm0, %v1335_v6 }
 0x2ee   : > { %v1337_v7 = vpop.eup %1336 }
 0x2ef   : > { %v1339_v8 = vpop.eup %1338  ;;  %1159 = vmatmul.mubr.msk.f32.gmra.mrb[10].mxu1 %vm629_vm0, %v1337_v7 }
 0x2f0   : > { %1161 = vmatprep.mubr.msk.f32.mxu1 %vm629_vm0, %v1339_v8 }
 0x2f2   : > { %v1341_v9 = vpop.eup %1340 }
 0x2f3   : > { %v1343_v10 = vpop.eup %1342  ;;  %1162 = vmatmul.mubr.msk.f32.gmra.mrb[12].mxu1 %vm629_vm0, %v1341_v9 }
 0x2f4   : > { %1164 = vmatprep.mubr.msk.f32.mxu1 %vm629_vm0, %v1343_v10 }
 0x2f6   : > { %v1345_v18 = vpop.eup %1344 }
 0x2f7   : > { %1165 = vmatmul.mubr.msk.f32.gmra.mrb[14].mxu1 %vm629_vm0, %v1345_v18 }
 0x3be   : > { %v1157_v20 = vpop.f32.mrb[8].mxu1 }
 0x3bf   : > { %1346 = vrcp.f32 %v1157_v20  ;;  %v768_v21 = vpop.f32.mrb[9].mxu1 }
 0x3c0   : > { %1348 = vrcp.f32 %v768_v21 }
 0x3c2   : > { %v1160_v22 = vpop.f32.mrb[10].mxu1 }
 0x3c3   : > { %1350 = vrcp.f32 %v1160_v22  ;;  %v778_v23 = vpop.f32.mrb[11].mxu1 }
 0x3c4   : > { %1352 = vrcp.f32 %v778_v23 }
 0x3c6   : > { %v1163_v24 = vpop.f32.mrb[12].mxu1 }
 0x3c7   : > { %v788_v25 = vpop.f32.mrb[13].mxu1  ;;  %1354 = vrcp.f32 %v1163_v24 }
 0x3c8   : > { %1356 = vrcp.f32 %v788_v25 }
 0x3c9   : > { %v1347_v26 = vpop.eup %1346 }
 0x3ca   : > { %v1349_v27 = vpop.eup %1348  ;;  %822 = vperm.xlu1 %1329, %v1347_v26   ;;  %v1166_v29 = vpop.f32.mrb[14].mxu1 }
 0x3cb   : > { %817 = vperm.xlu0 %1328, %v1349_v27   ;;  %v798_v30 = vpop.f32.mrb[15].mxu1 }
 0x3cc   : > { %1358 = vrcp.f32 %v798_v30 }
 0x3cd   : > { %v1351_v0 = vpop.eup %1350  ;;  %1360 = vrcp.f32 %v1166_v29 }
 0x3ce   : > { %832 = vperm.xlu1 %1329, %v1351_v0   ;;  %v1353_v31 = vpop.eup %1352 }
 0x3d1   : > { %v1355_v32 = vpop.eup %1354 }
 0x3d2   : > { %827 = vperm.xlu1 %1329, %v1353_v31   ;;  %v1357_v33 = vpop.eup %1356 }
 0x3d6   : > { %842 = vperm.xlu1 %1329, %v1355_v32   ;;  %v1359_v35 = vpop.eup %1358 }
 0x3d7   : > { %v1361_v36 = vpop.eup %1360 }
 0x3da   : > { %837 = vperm.xlu1 %1329, %v1357_v33  }
 0x3de   : > { %847 = vperm.xlu1 %1329, %v1359_v35  }
 0x3e2   : > { %852 = vperm.xlu1 %1329, %v1361_v36  }
 0x449   : > { %v823_v28 = vpop.permute.xlu1 %822 }
 0x44a   : > { %v856_v38 = vmul.f32 %v1157_v20, %v823_v28  ;;  %v818_v39 = vpop.permute.xlu0 %817 }
 0x44b   : > { %v855_v40 = vmul.f32 %v818_v39, %v768_v21 }
 0x44c   : > { %v865_v41 = vmul.f32 %v863_v37, %v856_v38 }
 0x44d   : > { %v864_v42 = vmul.f32 %v863_v37, %v855_v40  ;;  %v833_v43 = vpop.permute.xlu1 %832 }
 0x44e   : > { %v873_v44 = vadd.f32 %v865_v41, %v1692_v11  ;;  %v858_v45 = vmul.f32 %v1160_v22, %v833_v43 }
 0x44f   : > { %v872_v46 = vadd.f32 %v864_v42, %v1688_v34 }
 0x450   : > { %881 = vst [vmem:[%s1767_s29 + $0x8] sm:$0xff] %v873_v44  ;;  %v867_v47 = vmul.f32 %v863_v37, %v858_v45 }
 0x451   : > { %880 = vst [vmem:[%s1767_s29] sm:$0xff] %v872_v46  ;;  %v828_v48 = vpop.permute.xlu1 %827 }
 0x452   : > { %v875_v49 = vadd.f32 %v867_v47, %v1700_v13  ;;  %v857_v50 = vmul.f32 %v828_v48, %v778_v23 }
 0x454   : > { %883 = vst [vmem:[%s1767_s29 + $0x18] sm:$0xff] %v875_v49  ;;  %v866_v11 = vmul.f32 %v863_v37, %v857_v50 }
 0x455   : > { %v843_v51 = vpop.permute.xlu1 %842 }
 0x456   : > { %v874_v34 = vadd.f32 %v866_v11, %v1695_v12  ;;  %v860_v52 = vmul.f32 %v1163_v24, %v843_v51 }
 0x458   : > { %882 = vst [vmem:[%s1767_s29 + $0x10] sm:$0xff] %v874_v34  ;;  %v869_v53 = vmul.f32 %v863_v37, %v860_v52 }
 0x459   : > { %v838_v54 = vpop.permute.xlu1 %837 }
 0x45a   : > { %v877_v55 = vadd.f32 %v869_v53, %v1710_v15  ;;  %v859_v56 = vmul.f32 %v838_v54, %v788_v25 }
 0x45c   : > { %885 = vst [vmem:[%s1767_s29 + $0x28] sm:$0xff] %v877_v55  ;;  %v868_v57 = vmul.f32 %v863_v37, %v859_v56 }
 0x45d   : > { %v848_v13 = vpop.permute.xlu1 %847 }
 0x45e   : > { %v876_v58 = vadd.f32 %v868_v57, %v1703_v14  ;;  %v861_v59 = vmul.f32 %v848_v13, %v798_v30 }
 0x460   : > { %884 = vst [vmem:[%s1767_s29 + $0x20] sm:$0xff] %v876_v58  ;;  %v870_v12 = vmul.f32 %v863_v37, %v861_v59 }
 0x461   : > { %v853_v60 = vpop.permute.xlu1 %852 }
 0x462   : > { %v878_v61 = vadd.f32 %v870_v12, %v1713_v16  ;;  %v862_v62 = vmul.f32 %v1166_v29, %v853_v60 }
 0x464   : > { %886 = vst [vmem:[%s1767_s29 + $0x30] sm:$0xff] %v878_v61  ;;  %v871_v15 = vmul.f32 %v863_v37, %v862_v62 }
 0x466   : > { %v879_v14 = vadd.f32 %v871_v15, %v1720_v17 }
 0x468   : > { %887 = vst [vmem:[%s1767_s29 + $0x38] sm:$0xff] %v879_v14 }
 0x469   : > { %1433 = shalt.err (!%p1430_p7)
}
 0x46a   : > { %s1434_s26 = scalar_lea.hbm %s1786_s5, 1024  ;;  %s1438_s14 = scalar_lea.hbm %s1838_s4, 2048 }
 0x46b   : > { %p1435_p9 = scmp.ne.s32.totalorder %s1786_s5, %s1434_s26  ;;  %p1439_p5 = scmp.lt.u32.totalorder %s1786_s5, %s1838_s4 }
 0x46c   : > { %p1440_p11 = scmp.lt.u32.totalorder %s1438_s14, %s1434_s26  ;;  %p1442_p4 = scmp.lt.u32.totalorder %s1434_s26, %s1786_s5 }
 0x46d   : > { %p1436_p2 = pnand %p1435_p9, %p1622_p12 }
 0x46e   : > { %p1441_p1 = por %p1440_p11, %p1439_p5 }
 0x46f   : > { %p1437_p0 = pneg %p1436_p2 }
 0x470   : > { %p1443_p6 = por %p1442_p4, %p1441_p1 }
 0x472   : > { %p1444_p8 = pnand %p1443_p6, %p1437_p0 }
 0x474   : > { %1447 = shalt.err (!%p1444_p8)
}
 0x475   : > { %s1501_s9 = smov 128   ;;  %s1502_s29 = smov 8  }
 0x476   : > { %1269 = dma.vmem_to_hbm [thread:$0]  (%p1622_p12), %s1788_s10, 1024, %s1786_s5, %s889_s6, %s1501_s9, %s1501_s9, %s1502_s29  }
 0x477 PF: > { %s917_s30 = sand.u32 1, %s1478_s17   ;;  %p1853_p10 = scmp.ne.s32.totalorder %s1843_s23, 0 }
 0x478   : > { %p1854_p13 = scmp.ge.s32.totalorder %s1490_s20, 2  ;;  %s918_s15 = scalar_lea.sflag [#allocation5], %s917_s30 }
 0x47a   : > { %p1280_p3 = pnand %p1854_p13, %p1853_p10 }
 0x47c   : > { %1473 = dma.done.wait (!%p1280_p3), %s918_s15, 1024  }
 0x47d   : > { %1475 = vsyncadd (!%p1280_p3), %s918_s15, 4294966272  ;;  %p19_p7 = scmp.ge.s32.totalorder %s1587_s28, 4   ;;  %s1855_s17 = smov %s1482_s18 }
 0x47e   : > { %s1856_s18 = smov %s1486_s19  ;;  %s1857_s19 = smov %s1618_s21 }
 0x47f   : > { %s1858_s20 = smov %s1587_s28  ;;  %21 = sbr.rel (!%p19_p7) target bundleno = 8 (0x8), region = 85 }
 0x486   :  { %923 = vsyncpa [#allocation4], 1 }
 0x487   :  { %925 = vsyncpa [#allocation4 + $0x1], 1 }
 0x488   :  { %926 = vsyncpa [#allocation7], 1 }
 0x489   :  { %927 = vsyncpa [#allocation5], 1 }
 0x48a   :  { %929 = vsyncpa [#allocation5 + $0x1], 1 }

</bundles_post_ra>
